<compile_context>
chip_gen: v5e
topology: v5e:2x2
jax: 0.10.0
libtpu: 0.0.40
codegen_flags: <defaults>
</compile_context>

<pallas_src>
import functools

import jax
import jax.numpy as jnp
from jax.experimental import pallas as pl
from jax.experimental.pallas import tpu as pltpu

# Direction order: [horizontal | vertical | main diagonal | anti-diagonal],
# as (dy, dx) unit steps.
_DIRS = ((0, 1), (1, 0), (1, 1), (1, -1))


# ----------------------------------------------------------------------------
# Pallas kernel: fused directional window-sum on one (4, C_blk, L=H*W) block.
# ----------------------------------------------------------------------------
def _dir2dir_sum_kernel(x_ref, o_ref, xp_ref, *, W, L, C_blk, K, halo):
    # x_ref : (4, C_blk, L)            input block (any float dtype)
    # o_ref : (4, C_blk, L)            output block
    # xp_ref: (4, C_blk, halo+L+halo)  f32 scratch with zero halos (VMEM)
    pad = K // 2

    # Zero the halos every step (cheap: a few vregs).  NOT done under
    # pl.when(program_id==0): with "parallel" megacore sharding a core may
    # never see grid step 0, so per-step zeroing is the only safe option.
    if halo > 0:
        z = jnp.zeros((4, C_blk, halo), jnp.float32)
        xp_ref[:, :, :halo] = z
        xp_ref[:, :, halo + L:] = z
    # Single upcast into the scratch (lane-aligned store: halo % 128 == 0).
    xp_ref[:, :, halo:halo + L] = x_ref[...].astype(jnp.float32)

    # Column (x-coordinate) of every flattened position; lane-only function.
    col = jax.lax.broadcasted_iota(jnp.int32, (C_blk, L), 1) % W

    for g, (dy, dx) in enumerate(_DIRS):
        acc = jnp.zeros((C_blk, L), jnp.float32)
        for k in range(K):                       # static, fully unrolled
            off = k - pad
            s = off * (dy * W + dx)              # flat shift for this tap
            v = xp_ref[g, :, halo + s: halo + s + L]
            # Vertical out-of-bounds taps land in the zero halo automatically;
            # only the row-wrap along x needs masking (directions with dx != 0).
            if dx != 0 and off != 0:
                xn = col + dx * off
                v = jnp.where((xn >= 0) & (xn < W), v, 0.0)
            acc = acc + v
        # Per-direction lane-dense store; no concatenate / relayout.
        o_ref[g] = acc.astype(o_ref.dtype)


# ----------------------------------------------------------------------------
# Block-size chooser: bound VMEM, prefer enough grid blocks for both v7x cores.
# ----------------------------------------------------------------------------
def _choose_c_block(C, N, L, halo, itemsize):
    per_c = 4 * (2 * L * itemsize          # input block, double-buffered
                 + 2 * L * itemsize        # output block, double-buffered
                 + (L + 2 * halo) * 4      # f32 padded scratch
                 + L * 4)                  # f32 accumulator
    budget = 8 * 1024 * 1024               # well under the 32 MiB scoped VMEM
    # Valid C_blk: multiple of 8 (sublane tiling) dividing C, or C itself.
    cand = sorted(set([d for d in range(8, C + 1, 8) if C % d == 0] + [C]))
    fits = [d for d in cand if d * per_c <= budget] or [cand[0]]
    want_tiles = max(1, -(-4 // max(N, 1)))  # >= ~4 total blocks (2 per v7x TC)
    good = [d for d in fits if C // d >= want_tiles]
    return max(good) if good else max(fits)


# ----------------------------------------------------------------------------
# Wrapper: NCHW in / NCHW out (PyTorch interface), zero HBM glue.
# ----------------------------------------------------------------------------
def dir2dir_sum(dir_input, win_length):
    N, C4, H, W = dir_input.shape
    if C4 % 4 != 0:
        raise ValueError("channel dim must be 4 * in_channels_per_dir")
    if win_length % 2 != 1:
        # PyTorch conv2d with padding=K//2 only yields 'same' output for odd K.
        raise ValueError("only odd win_length ('same' zero padding) supported")
    C = C4 // 4
    K = win_length
    pad = K // 2
    L = H * W
    smax = pad * (W + 1)                        # largest |flat shift|
    halo = 0 if smax == 0 else ((smax + 127) // 128) * 128   # lane-aligned halo

    dtype = dir_input.dtype
    itemsize = jnp.dtype(dtype).itemsize
    c_blk = _choose_c_block(C, N, L, halo, itemsize)
    n_ct = C // c_blk

    # Free metadata reshape: split 4C -> (4, C), merge (H, W) -> L.
    x4 = dir_input.reshape(N, 4, C, L)

    kernel = functools.partial(_dir2dir_sum_kernel,
                               W=W, L=L, C_blk=c_blk, K=K, halo=halo)

    out4 = pl.pallas_call(
        kernel,
        out_shape=jax.ShapeDtypeStruct((N, 4, C, L), dtype),
        grid_spec=pltpu.PrefetchScalarGridSpec(
            num_scalar_prefetch=0,
            grid=(N, n_ct),
            in_specs=[pl.BlockSpec((None, 4, c_blk, L),
                                   lambda n, c: (n, 0, c, 0))],
            out_specs=pl.BlockSpec((None, 4, c_blk, L),
                                   lambda n, c: (n, 0, c, 0)),
            scratch_shapes=[pltpu.VMEM((4, c_blk, L + 2 * halo), jnp.float32)],
        ),
        compiler_params=pltpu.CompilerParams(
            dimension_semantics=("parallel", "parallel"),
            vmem_limit_bytes=32 * 1024 * 1024,
        ),
    )(x4)

    # Free metadata reshape back to NCHW.
    return out4.reshape(N, C4, H, W)


# ----------------------------------------------------------------------------
# Module mirroring the PyTorch class.
# ----------------------------------------------------------------------------
class Dir2DirSum:
    def __init__(self, in_channels_per_dir, win_length):
        self.in_channels_per_dir = in_channels_per_dir
        self.win_length = win_length
        # torch.ones(C).diag_embed().unsqueeze(2).repeat(1,1,K): identity
        # channel mixing with all-ones taps.  Kept for fidelity; the forward
        # exploits it (pure window sum, no matmul).
        self.sum_kernel = jnp.repeat(
            jnp.eye(in_channels_per_dir, dtype=jnp.float32)[:, :, None],
            win_length, axis=2)
        # jit so the boundary reshapes are pure metadata (no HBM copies).
        self._fwd = jax.jit(functools.partial(dir2dir_sum,
                                              win_length=win_length))

    def __call__(self, dir_input):
        assert dir_input.shape[1] == 4 * self.in_channels_per_dir
        return self._fwd(dir_input)


# ----------------------------------------------------------------------------
# Pure-JAX (non-Pallas) NCHW reference for validation.
# ----------------------------------------------------------------------------
def _reference(x, K):
    N, C4, H, W = x.shape
    C = C4 // 4
    pad = K // 2
    xp = jnp.pad(x.astype(jnp.float32),
                 ((0, 0), (0, 0), (pad, pad), (pad, pad)))
    outs = []
    for g, (dy, dx) in enumerate(_DIRS):
        xg = xp[:, g * C:(g + 1) * C]
        acc = jnp.zeros((N, C, H, W), jnp.float32)
        for k in range(K):
            off = k - pad
            hs = pad + dy * off
            ws = pad + dx * off
            acc = acc + xg[:, :, hs:hs + H, ws:ws + W]
        outs.append(acc)
    return jnp.concatenate(outs, axis=1).astype(x.dtype)


if __name__ == "__main__":
    key = jax.random.PRNGKey(0)

    # Small shapes: batch=2, in_channels_per_dir=4 (=> 16 input channels),
    # 16x16 board, win_length=5.  Output: (2, 16, 16, 16).
    N, C_per_dir, H, W = 2, 4, 16, 16
    K = 5

    x = jax.random.normal(key, (N, 4 * C_per_dir, H, W), jnp.float32)
    mod = Dir2DirSum(C_per_dir, K)

    out = jax.block_until_ready(mod(x))
    assert out.shape == (N, 4 * C_per_dir, H, W), out.shape
    assert bool(jnp.all(jnp.isfinite(out)))

    ref = _reference(x, K)
    max_err = float(jnp.max(jnp.abs(out - ref)))
    assert max_err < 1e-4, f"f32 mismatch vs reference: {max_err}"

    # bf16 end-to-end (memory-bound op => ~2x less HBM traffic); f32 accumulate.
    xb = x.astype(jnp.bfloat16)
    outb = jax.block_until_ready(mod(xb))
    err_b = float(jnp.max(jnp.abs(outb.astype(jnp.float32)
                                  - _reference(xb, K).astype(jnp.float32))))
    assert err_b < 0.25, f"bf16 mismatch vs reference: {err_b}"

    print("KERNEL_OK")
</pallas_src>

<mosaic_0001>
module attributes {stable_mosaic.version = 11 : i64} {
  func.func @_dir2dir_sum_kernel(%arg0: i32, %arg1: i32, %arg2: memref<1x4x4x256xf32, #tpu.memory_space<vmem>>, %arg3: memref<1x4x4x256xf32, #tpu.memory_space<vmem>>, %arg4: memref<4x4x512xf32, #tpu.memory_space<vmem>>) attributes {dimension_semantics = [#tpu.dimension_semantics<parallel>, #tpu.dimension_semantics<parallel>], iteration_bounds = array<i64: 2, 1>, scalar_prefetch = 0 : i64, scratch_operands = 1 : i64, tpu.core_type = #tpu.core_type<tc>, window_params = [{transform_indices = @transform_0, window_bounds = array<i64: 1, 4, 4, 256>}, {transform_indices = @transform_1, window_bounds = array<i64: 1, 4, 4, 256>}]} {
    %cst = arith.constant 0.000000e+00 : f32
    %0 = vector.broadcast %cst : f32 to vector<4x4x128xf32>
    %c0 = arith.constant 0 : index
    %c0_0 = arith.constant 0 : index
    %c0_1 = arith.constant 0 : index
    %1 = vector.load %arg4[%c0, %c0_0, %c0_1] : memref<4x4x512xf32, #tpu.memory_space<vmem>>, vector<4x4x128xf32>
    tpu.vector_store %arg4[%c0, %c0_0, %c0_1], %0 {strides = array<i32>} : memref<4x4x512xf32, #tpu.memory_space<vmem>>, vector<4x4x128xf32>,
    %c0_2 = arith.constant 0 : index
    %c0_3 = arith.constant 0 : index
    %c384 = arith.constant 384 : index
    %2 = vector.load %arg4[%c0_2, %c0_3, %c384] : memref<4x4x512xf32, #tpu.memory_space<vmem>>, vector<4x4x128xf32>
    tpu.vector_store %arg4[%c0_2, %c0_3, %c384], %0 {strides = array<i32>} : memref<4x4x512xf32, #tpu.memory_space<vmem>>, vector<4x4x128xf32>,
    %c0_4 = arith.constant 0 : index
    %c0_5 = arith.constant 0 : index
    %c0_6 = arith.constant 0 : index
    %c0_7 = arith.constant 0 : index
    %3 = vector.load %arg2[%c0_4, %c0_5, %c0_6, %c0_7] : memref<1x4x4x256xf32, #tpu.memory_space<vmem>>, vector<1x4x4x256xf32>
    %4 = vector.shape_cast %3 : vector<1x4x4x256xf32> to vector<4x4x256xf32>
    %c0_8 = arith.constant 0 : index
    %c0_9 = arith.constant 0 : index
    %c128 = arith.constant 128 : index
    %5 = vector.load %arg4[%c0_8, %c0_9, %c128] : memref<4x4x512xf32, #tpu.memory_space<vmem>>, vector<4x4x256xf32>
    tpu.vector_store %arg4[%c0_8, %c0_9, %c128], %4 {strides = array<i32>} : memref<4x4x512xf32, #tpu.memory_space<vmem>>, vector<4x4x256xf32>,
    %6 = tpu.iota {dimensions = array<i32: 1>} : vector<4x256xi32>
    %c16_i32 = arith.constant 16 : i32
    %c0_i32 = arith.constant 0 : i32
    %7 = arith.cmpi eq, %c16_i32, %c0_i32 : i32
    %c1_i32 = arith.constant 1 : i32
    %8 = arith.select %7, %c1_i32, %c16_i32 : i32
    %9 = vector.broadcast %8 : i32 to vector<4x256xi32>
    %10 = arith.remsi %6, %9 : vector<4x256xi32>
    %c0_i32_10 = arith.constant 0 : i32
    %11 = vector.broadcast %c0_i32_10 : i32 to vector<4x256xi32>
    %12 = arith.cmpi ne, %10, %11 : vector<4x256xi32>
    %c0_i32_11 = arith.constant 0 : i32
    %13 = vector.broadcast %c0_i32_11 : i32 to vector<4x256xi32>
    %14 = arith.cmpi slt, %10, %13 : vector<4x256xi32>
    %c0_i32_12 = arith.constant 0 : i32
    %15 = arith.cmpi slt, %8, %c0_i32_12 : i32
    %16 = vector.broadcast %15 : i1 to vector<4x256xi1>
    %17 = vector.broadcast %16 : vector<4x256xi1> to vector<4x256xi1>
    %18 = arith.xori %14, %17 : vector<4x256xi1>
    %19 = arith.andi %18, %12 : vector<4x256xi1>
    %20 = vector.broadcast %8 : i32 to vector<4x256xi32>
    %21 = arith.addi %10, %20 : vector<4x256xi32>
    %22 = arith.select %19, %21, %10 : vector<4x256xi1>, vector<4x256xi32>
    %cst_13 = arith.constant 0.000000e+00 : f32
    %23 = vector.broadcast %cst_13 : f32 to vector<4x256xf32>
    %c0_14 = arith.constant 0 : index
    %c0_15 = arith.constant 0 : index
    %c126 = arith.constant 126 : index
    %24 = vector.load %arg4[%c0_14, %c0_15, %c126] : memref<4x4x512xf32, #tpu.memory_space<vmem>>, vector<1x4x256xf32>
    %25 = vector.shape_cast %24 : vector<1x4x256xf32> to vector<4x256xf32>
    %c-2_i32 = arith.constant -2 : i32
    %26 = vector.broadcast %c-2_i32 : i32 to vector<4x256xi32>
    %27 = arith.addi %22, %26 : vector<4x256xi32>
    %c0_i32_16 = arith.constant 0 : i32
    %28 = vector.broadcast %c0_i32_16 : i32 to vector<4x256xi32>
    %29 = arith.cmpi sge, %27, %28 : vector<4x256xi32>
    %c16_i32_17 = arith.constant 16 : i32
    %30 = vector.broadcast %c16_i32_17 : i32 to vector<4x256xi32>
    %31 = arith.cmpi slt, %27, %30 : vector<4x256xi32>
    %32 = arith.andi %29, %31 : vector<4x256xi1>
    %cst_18 = arith.constant 0.000000e+00 : f32
    %33 = vector.broadcast %cst_18 : f32 to vector<4x256xf32>
    %34 = arith.select %32, %25, %33 : vector<4x256xi1>, vector<4x256xf32>
    %35 = arith.addf %23, %34 : vector<4x256xf32>
    %c0_19 = arith.constant 0 : index
    %c0_20 = arith.constant 0 : index
    %c127 = arith.constant 127 : index
    %36 = vector.load %arg4[%c0_19, %c0_20, %c127] : memref<4x4x512xf32, #tpu.memory_space<vmem>>, vector<1x4x256xf32>
    %37 = vector.shape_cast %36 : vector<1x4x256xf32> to vector<4x256xf32>
    %c-1_i32 = arith.constant -1 : i32
    %38 = vector.broadcast %c-1_i32 : i32 to vector<4x256xi32>
    %39 = arith.addi %22, %38 : vector<4x256xi32>
    %c0_i32_21 = arith.constant 0 : i32
    %40 = vector.broadcast %c0_i32_21 : i32 to vector<4x256xi32>
    %41 = arith.cmpi sge, %39, %40 : vector<4x256xi32>
    %c16_i32_22 = arith.constant 16 : i32
    %42 = vector.broadcast %c16_i32_22 : i32 to vector<4x256xi32>
    %43 = arith.cmpi slt, %39, %42 : vector<4x256xi32>
    %44 = arith.andi %41, %43 : vector<4x256xi1>
    %cst_23 = arith.constant 0.000000e+00 : f32
    %45 = vector.broadcast %cst_23 : f32 to vector<4x256xf32>
    %46 = arith.select %44, %37, %45 : vector<4x256xi1>, vector<4x256xf32>
    %47 = arith.addf %35, %46 : vector<4x256xf32>
    %c0_24 = arith.constant 0 : index
    %c0_25 = arith.constant 0 : index
    %c128_26 = arith.constant 128 : index
    %48 = vector.load %arg4[%c0_24, %c0_25, %c128_26] : memref<4x4x512xf32, #tpu.memory_space<vmem>>, vector<1x4x256xf32>
    %49 = vector.shape_cast %48 : vector<1x4x256xf32> to vector<4x256xf32>
    %50 = arith.addf %47, %49 : vector<4x256xf32>
    %c0_27 = arith.constant 0 : index
    %c0_28 = arith.constant 0 : index
    %c129 = arith.constant 129 : index
    %51 = vector.load %arg4[%c0_27, %c0_28, %c129] : memref<4x4x512xf32, #tpu.memory_space<vmem>>, vector<1x4x256xf32>
    %52 = vector.shape_cast %51 : vector<1x4x256xf32> to vector<4x256xf32>
    %c1_i32_29 = arith.constant 1 : i32
    %53 = vector.broadcast %c1_i32_29 : i32 to vector<4x256xi32>
    %54 = arith.addi %22, %53 : vector<4x256xi32>
    %c0_i32_30 = arith.constant 0 : i32
    %55 = vector.broadcast %c0_i32_30 : i32 to vector<4x256xi32>
    %56 = arith.cmpi sge, %54, %55 : vector<4x256xi32>
    %c16_i32_31 = arith.constant 16 : i32
    %57 = vector.broadcast %c16_i32_31 : i32 to vector<4x256xi32>
    %58 = arith.cmpi slt, %54, %57 : vector<4x256xi32>
    %59 = arith.andi %56, %58 : vector<4x256xi1>
    %cst_32 = arith.constant 0.000000e+00 : f32
    %60 = vector.broadcast %cst_32 : f32 to vector<4x256xf32>
    %61 = arith.select %59, %52, %60 : vector<4x256xi1>, vector<4x256xf32>
    %62 = arith.addf %50, %61 : vector<4x256xf32>
    %c0_33 = arith.constant 0 : index
    %c0_34 = arith.constant 0 : index
    %c130 = arith.constant 130 : index
    %63 = vector.load %arg4[%c0_33, %c0_34, %c130] : memref<4x4x512xf32, #tpu.memory_space<vmem>>, vector<1x4x256xf32>
    %64 = vector.shape_cast %63 : vector<1x4x256xf32> to vector<4x256xf32>
    %c2_i32 = arith.constant 2 : i32
    %65 = vector.broadcast %c2_i32 : i32 to vector<4x256xi32>
    %66 = arith.addi %22, %65 : vector<4x256xi32>
    %c0_i32_35 = arith.constant 0 : i32
    %67 = vector.broadcast %c0_i32_35 : i32 to vector<4x256xi32>
    %68 = arith.cmpi sge, %66, %67 : vector<4x256xi32>
    %c16_i32_36 = arith.constant 16 : i32
    %69 = vector.broadcast %c16_i32_36 : i32 to vector<4x256xi32>
    %70 = arith.cmpi slt, %66, %69 : vector<4x256xi32>
    %71 = arith.andi %68, %70 : vector<4x256xi1>
    %cst_37 = arith.constant 0.000000e+00 : f32
    %72 = vector.broadcast %cst_37 : f32 to vector<4x256xf32>
    %73 = arith.select %71, %64, %72 : vector<4x256xi1>, vector<4x256xf32>
    %74 = arith.addf %62, %73 : vector<4x256xf32>
    %c0_38 = arith.constant 0 : index
    %c0_39 = arith.constant 0 : index
    %c0_40 = arith.constant 0 : index
    %c0_41 = arith.constant 0 : index
    %75 = vector.load %arg3[%c0_38, %c0_39, %c0_40, %c0_41] : memref<1x4x4x256xf32, #tpu.memory_space<vmem>>, vector<1x1x4x256xf32>
    %76 = vector.shape_cast %75 : vector<1x1x4x256xf32> to vector<4x256xf32>
    %77 = vector.shape_cast %74 : vector<4x256xf32> to vector<1x1x4x256xf32>
    tpu.vector_store %arg3[%c0_38, %c0_39, %c0_40, %c0_41], %77 {strides = array<i32>} : memref<1x4x4x256xf32, #tpu.memory_space<vmem>>, vector<1x1x4x256xf32>,
    %cst_42 = arith.constant 0.000000e+00 : f32
    %78 = vector.broadcast %cst_42 : f32 to vector<4x256xf32>
    %c1 = arith.constant 1 : index
    %c0_43 = arith.constant 0 : index
    %c96 = arith.constant 96 : index
    %79 = vector.load %arg4[%c1, %c0_43, %c96] : memref<4x4x512xf32, #tpu.memory_space<vmem>>, vector<1x4x256xf32>
    %80 = vector.shape_cast %79 : vector<1x4x256xf32> to vector<4x256xf32>
    %81 = arith.addf %78, %80 : vector<4x256xf32>
    %c1_44 = arith.constant 1 : index
    %c0_45 = arith.constant 0 : index
    %c112 = arith.constant 112 : index
    %82 = vector.load %arg4[%c1_44, %c0_45, %c112] : memref<4x4x512xf32, #tpu.memory_space<vmem>>, vector<1x4x256xf32>
    %83 = vector.shape_cast %82 : vector<1x4x256xf32> to vector<4x256xf32>
    %84 = arith.addf %81, %83 : vector<4x256xf32>
    %c1_46 = arith.constant 1 : index
    %c0_47 = arith.constant 0 : index
    %c128_48 = arith.constant 128 : index
    %85 = vector.load %arg4[%c1_46, %c0_47, %c128_48] : memref<4x4x512xf32, #tpu.memory_space<vmem>>, vector<1x4x256xf32>
    %86 = vector.shape_cast %85 : vector<1x4x256xf32> to vector<4x256xf32>
    %87 = arith.addf %84, %86 : vector<4x256xf32>
    %c1_49 = arith.constant 1 : index
    %c0_50 = arith.constant 0 : index
    %c144 = arith.constant 144 : index
    %88 = vector.load %arg4[%c1_49, %c0_50, %c144] : memref<4x4x512xf32, #tpu.memory_space<vmem>>, vector<1x4x256xf32>
    %89 = vector.shape_cast %88 : vector<1x4x256xf32> to vector<4x256xf32>
    %90 = arith.addf %87, %89 : vector<4x256xf32>
    %c1_51 = arith.constant 1 : index
    %c0_52 = arith.constant 0 : index
    %c160 = arith.constant 160 : index
    %91 = vector.load %arg4[%c1_51, %c0_52, %c160] : memref<4x4x512xf32, #tpu.memory_space<vmem>>, vector<1x4x256xf32>
    %92 = vector.shape_cast %91 : vector<1x4x256xf32> to vector<4x256xf32>
    %93 = arith.addf %90, %92 : vector<4x256xf32>
    %c0_53 = arith.constant 0 : index
    %c1_54 = arith.constant 1 : index
    %c0_55 = arith.constant 0 : index
    %c0_56 = arith.constant 0 : index
    %94 = vector.load %arg3[%c0_53, %c1_54, %c0_55, %c0_56] : memref<1x4x4x256xf32, #tpu.memory_space<vmem>>, vector<1x1x4x256xf32>
    %95 = vector.shape_cast %94 : vector<1x1x4x256xf32> to vector<4x256xf32>
    %96 = vector.shape_cast %93 : vector<4x256xf32> to vector<1x1x4x256xf32>
    tpu.vector_store %arg3[%c0_53, %c1_54, %c0_55, %c0_56], %96 {strides = array<i32>} : memref<1x4x4x256xf32, #tpu.memory_space<vmem>>, vector<1x1x4x256xf32>,
    %cst_57 = arith.constant 0.000000e+00 : f32
    %97 = vector.broadcast %cst_57 : f32 to vector<4x256xf32>
    %c2 = arith.constant 2 : index
    %c0_58 = arith.constant 0 : index
    %c94 = arith.constant 94 : index
    %98 = vector.load %arg4[%c2, %c0_58, %c94] : memref<4x4x512xf32, #tpu.memory_space<vmem>>, vector<1x4x256xf32>
    %99 = vector.shape_cast %98 : vector<1x4x256xf32> to vector<4x256xf32>
    %c-2_i32_59 = arith.constant -2 : i32
    %100 = vector.broadcast %c-2_i32_59 : i32 to vector<4x256xi32>
    %101 = arith.addi %22, %100 : vector<4x256xi32>
    %c0_i32_60 = arith.constant 0 : i32
    %102 = vector.broadcast %c0_i32_60 : i32 to vector<4x256xi32>
    %103 = arith.cmpi sge, %101, %102 : vector<4x256xi32>
    %c16_i32_61 = arith.constant 16 : i32
    %104 = vector.broadcast %c16_i32_61 : i32 to vector<4x256xi32>
    %105 = arith.cmpi slt, %101, %104 : vector<4x256xi32>
    %106 = arith.andi %103, %105 : vector<4x256xi1>
    %cst_62 = arith.constant 0.000000e+00 : f32
    %107 = vector.broadcast %cst_62 : f32 to vector<4x256xf32>
    %108 = arith.select %106, %99, %107 : vector<4x256xi1>, vector<4x256xf32>
    %109 = arith.addf %97, %108 : vector<4x256xf32>
    %c2_63 = arith.constant 2 : index
    %c0_64 = arith.constant 0 : index
    %c111 = arith.constant 111 : index
    %110 = vector.load %arg4[%c2_63, %c0_64, %c111] : memref<4x4x512xf32, #tpu.memory_space<vmem>>, vector<1x4x256xf32>
    %111 = vector.shape_cast %110 : vector<1x4x256xf32> to vector<4x256xf32>
    %c-1_i32_65 = arith.constant -1 : i32
    %112 = vector.broadcast %c-1_i32_65 : i32 to vector<4x256xi32>
    %113 = arith.addi %22, %112 : vector<4x256xi32>
    %c0_i32_66 = arith.constant 0 : i32
    %114 = vector.broadcast %c0_i32_66 : i32 to vector<4x256xi32>
    %115 = arith.cmpi sge, %113, %114 : vector<4x256xi32>
    %c16_i32_67 = arith.constant 16 : i32
    %116 = vector.broadcast %c16_i32_67 : i32 to vector<4x256xi32>
    %117 = arith.cmpi slt, %113, %116 : vector<4x256xi32>
    %118 = arith.andi %115, %117 : vector<4x256xi1>
    %cst_68 = arith.constant 0.000000e+00 : f32
    %119 = vector.broadcast %cst_68 : f32 to vector<4x256xf32>
    %120 = arith.select %118, %111, %119 : vector<4x256xi1>, vector<4x256xf32>
    %121 = arith.addf %109, %120 : vector<4x256xf32>
    %c2_69 = arith.constant 2 : index
    %c0_70 = arith.constant 0 : index
    %c128_71 = arith.constant 128 : index
    %122 = vector.load %arg4[%c2_69, %c0_70, %c128_71] : memref<4x4x512xf32, #tpu.memory_space<vmem>>, vector<1x4x256xf32>
    %123 = vector.shape_cast %122 : vector<1x4x256xf32> to vector<4x256xf32>
    %124 = arith.addf %121, %123 : vector<4x256xf32>
    %c2_72 = arith.constant 2 : index
    %c0_73 = arith.constant 0 : index
    %c145 = arith.constant 145 : index
    %125 = vector.load %arg4[%c2_72, %c0_73, %c145] : memref<4x4x512xf32, #tpu.memory_space<vmem>>, vector<1x4x256xf32>
    %126 = vector.shape_cast %125 : vector<1x4x256xf32> to vector<4x256xf32>
    %c1_i32_74 = arith.constant 1 : i32
    %127 = vector.broadcast %c1_i32_74 : i32 to vector<4x256xi32>
    %128 = arith.addi %22, %127 : vector<4x256xi32>
    %c0_i32_75 = arith.constant 0 : i32
    %129 = vector.broadcast %c0_i32_75 : i32 to vector<4x256xi32>
    %130 = arith.cmpi sge, %128, %129 : vector<4x256xi32>
    %c16_i32_76 = arith.constant 16 : i32
    %131 = vector.broadcast %c16_i32_76 : i32 to vector<4x256xi32>
    %132 = arith.cmpi slt, %128, %131 : vector<4x256xi32>
    %133 = arith.andi %130, %132 : vector<4x256xi1>
    %cst_77 = arith.constant 0.000000e+00 : f32
    %134 = vector.broadcast %cst_77 : f32 to vector<4x256xf32>
    %135 = arith.select %133, %126, %134 : vector<4x256xi1>, vector<4x256xf32>
    %136 = arith.addf %124, %135 : vector<4x256xf32>
    %c2_78 = arith.constant 2 : index
    %c0_79 = arith.constant 0 : index
    %c162 = arith.constant 162 : index
    %137 = vector.load %arg4[%c2_78, %c0_79, %c162] : memref<4x4x512xf32, #tpu.memory_space<vmem>>, vector<1x4x256xf32>
    %138 = vector.shape_cast %137 : vector<1x4x256xf32> to vector<4x256xf32>
    %c2_i32_80 = arith.constant 2 : i32
    %139 = vector.broadcast %c2_i32_80 : i32 to vector<4x256xi32>
    %140 = arith.addi %22, %139 : vector<4x256xi32>
    %c0_i32_81 = arith.constant 0 : i32
    %141 = vector.broadcast %c0_i32_81 : i32 to vector<4x256xi32>
    %142 = arith.cmpi sge, %140, %141 : vector<4x256xi32>
    %c16_i32_82 = arith.constant 16 : i32
    %143 = vector.broadcast %c16_i32_82 : i32 to vector<4x256xi32>
    %144 = arith.cmpi slt, %140, %143 : vector<4x256xi32>
    %145 = arith.andi %142, %144 : vector<4x256xi1>
    %cst_83 = arith.constant 0.000000e+00 : f32
    %146 = vector.broadcast %cst_83 : f32 to vector<4x256xf32>
    %147 = arith.select %145, %138, %146 : vector<4x256xi1>, vector<4x256xf32>
    %148 = arith.addf %136, %147 : vector<4x256xf32>
    %c0_84 = arith.constant 0 : index
    %c2_85 = arith.constant 2 : index
    %c0_86 = arith.constant 0 : index
    %c0_87 = arith.constant 0 : index
    %149 = vector.load %arg3[%c0_84, %c2_85, %c0_86, %c0_87] : memref<1x4x4x256xf32, #tpu.memory_space<vmem>>, vector<1x1x4x256xf32>
    %150 = vector.shape_cast %149 : vector<1x1x4x256xf32> to vector<4x256xf32>
    %151 = vector.shape_cast %148 : vector<4x256xf32> to vector<1x1x4x256xf32>
    tpu.vector_store %arg3[%c0_84, %c2_85, %c0_86, %c0_87], %151 {strides = array<i32>} : memref<1x4x4x256xf32, #tpu.memory_space<vmem>>, vector<1x1x4x256xf32>,
    %cst_88 = arith.constant 0.000000e+00 : f32
    %152 = vector.broadcast %cst_88 : f32 to vector<4x256xf32>
    %c3 = arith.constant 3 : index
    %c0_89 = arith.constant 0 : index
    %c98 = arith.constant 98 : index
    %153 = vector.load %arg4[%c3, %c0_89, %c98] : memref<4x4x512xf32, #tpu.memory_space<vmem>>, vector<1x4x256xf32>
    %154 = vector.shape_cast %153 : vector<1x4x256xf32> to vector<4x256xf32>
    %c2_i32_90 = arith.constant 2 : i32
    %155 = vector.broadcast %c2_i32_90 : i32 to vector<4x256xi32>
    %156 = arith.addi %22, %155 : vector<4x256xi32>
    %c0_i32_91 = arith.constant 0 : i32
    %157 = vector.broadcast %c0_i32_91 : i32 to vector<4x256xi32>
    %158 = arith.cmpi sge, %156, %157 : vector<4x256xi32>
    %c16_i32_92 = arith.constant 16 : i32
    %159 = vector.broadcast %c16_i32_92 : i32 to vector<4x256xi32>
    %160 = arith.cmpi slt, %156, %159 : vector<4x256xi32>
    %161 = arith.andi %158, %160 : vector<4x256xi1>
    %cst_93 = arith.constant 0.000000e+00 : f32
    %162 = vector.broadcast %cst_93 : f32 to vector<4x256xf32>
    %163 = arith.select %161, %154, %162 : vector<4x256xi1>, vector<4x256xf32>
    %164 = arith.addf %152, %163 : vector<4x256xf32>
    %c3_94 = arith.constant 3 : index
    %c0_95 = arith.constant 0 : index
    %c113 = arith.constant 113 : index
    %165 = vector.load %arg4[%c3_94, %c0_95, %c113] : memref<4x4x512xf32, #tpu.memory_space<vmem>>, vector<1x4x256xf32>
    %166 = vector.shape_cast %165 : vector<1x4x256xf32> to vector<4x256xf32>
    %c1_i32_96 = arith.constant 1 : i32
    %167 = vector.broadcast %c1_i32_96 : i32 to vector<4x256xi32>
    %168 = arith.addi %22, %167 : vector<4x256xi32>
    %c0_i32_97 = arith.constant 0 : i32
    %169 = vector.broadcast %c0_i32_97 : i32 to vector<4x256xi32>
    %170 = arith.cmpi sge, %168, %169 : vector<4x256xi32>
    %c16_i32_98 = arith.constant 16 : i32
    %171 = vector.broadcast %c16_i32_98 : i32 to vector<4x256xi32>
    %172 = arith.cmpi slt, %168, %171 : vector<4x256xi32>
    %173 = arith.andi %170, %172 : vector<4x256xi1>
    %cst_99 = arith.constant 0.000000e+00 : f32
    %174 = vector.broadcast %cst_99 : f32 to vector<4x256xf32>
    %175 = arith.select %173, %166, %174 : vector<4x256xi1>, vector<4x256xf32>
    %176 = arith.addf %164, %175 : vector<4x256xf32>
    %c3_100 = arith.constant 3 : index
    %c0_101 = arith.constant 0 : index
    %c128_102 = arith.constant 128 : index
    %177 = vector.load %arg4[%c3_100, %c0_101, %c128_102] : memref<4x4x512xf32, #tpu.memory_space<vmem>>, vector<1x4x256xf32>
    %178 = vector.shape_cast %177 : vector<1x4x256xf32> to vector<4x256xf32>
    %179 = arith.addf %176, %178 : vector<4x256xf32>
    %c3_103 = arith.constant 3 : index
    %c0_104 = arith.constant 0 : index
    %c143 = arith.constant 143 : index
    %180 = vector.load %arg4[%c3_103, %c0_104, %c143] : memref<4x4x512xf32, #tpu.memory_space<vmem>>, vector<1x4x256xf32>
    %181 = vector.shape_cast %180 : vector<1x4x256xf32> to vector<4x256xf32>
    %c-1_i32_105 = arith.constant -1 : i32
    %182 = vector.broadcast %c-1_i32_105 : i32 to vector<4x256xi32>
    %183 = arith.addi %22, %182 : vector<4x256xi32>
    %c0_i32_106 = arith.constant 0 : i32
    %184 = vector.broadcast %c0_i32_106 : i32 to vector<4x256xi32>
    %185 = arith.cmpi sge, %183, %184 : vector<4x256xi32>
    %c16_i32_107 = arith.constant 16 : i32
    %186 = vector.broadcast %c16_i32_107 : i32 to vector<4x256xi32>
    %187 = arith.cmpi slt, %183, %186 : vector<4x256xi32>
    %188 = arith.andi %185, %187 : vector<4x256xi1>
    %cst_108 = arith.constant 0.000000e+00 : f32
    %189 = vector.broadcast %cst_108 : f32 to vector<4x256xf32>
    %190 = arith.select %188, %181, %189 : vector<4x256xi1>, vector<4x256xf32>
    %191 = arith.addf %179, %190 : vector<4x256xf32>
    %c3_109 = arith.constant 3 : index
    %c0_110 = arith.constant 0 : index
    %c158 = arith.constant 158 : index
    %192 = vector.load %arg4[%c3_109, %c0_110, %c158] : memref<4x4x512xf32, #tpu.memory_space<vmem>>, vector<1x4x256xf32>
    %193 = vector.shape_cast %192 : vector<1x4x256xf32> to vector<4x256xf32>
    %c-2_i32_111 = arith.constant -2 : i32
    %194 = vector.broadcast %c-2_i32_111 : i32 to vector<4x256xi32>
    %195 = arith.addi %22, %194 : vector<4x256xi32>
    %c0_i32_112 = arith.constant 0 : i32
    %196 = vector.broadcast %c0_i32_112 : i32 to vector<4x256xi32>
    %197 = arith.cmpi sge, %195, %196 : vector<4x256xi32>
    %c16_i32_113 = arith.constant 16 : i32
    %198 = vector.broadcast %c16_i32_113 : i32 to vector<4x256xi32>
    %199 = arith.cmpi slt, %195, %198 : vector<4x256xi32>
    %200 = arith.andi %197, %199 : vector<4x256xi1>
    %cst_114 = arith.constant 0.000000e+00 : f32
    %201 = vector.broadcast %cst_114 : f32 to vector<4x256xf32>
    %202 = arith.select %200, %193, %201 : vector<4x256xi1>, vector<4x256xf32>
    %203 = arith.addf %191, %202 : vector<4x256xf32>
    %c0_115 = arith.constant 0 : index
    %c3_116 = arith.constant 3 : index
    %c0_117 = arith.constant 0 : index
    %c0_118 = arith.constant 0 : index
    %204 = vector.load %arg3[%c0_115, %c3_116, %c0_117, %c0_118] : memref<1x4x4x256xf32, #tpu.memory_space<vmem>>, vector<1x1x4x256xf32>
    %205 = vector.shape_cast %204 : vector<1x1x4x256xf32> to vector<4x256xf32>
    %206 = vector.shape_cast %203 : vector<4x256xf32> to vector<1x1x4x256xf32>
    tpu.vector_store %arg3[%c0_115, %c3_116, %c0_117, %c0_118], %206 {strides = array<i32>} : memref<1x4x4x256xf32, #tpu.memory_space<vmem>>, vector<1x1x4x256xf32>,
    return
  }
  func.func @transform_0(%arg0: i32, %arg1: i32) -> (i32, i32, i32, i32) {
    %c0_i32 = arith.constant 0 : i32
    %c0_i32_0 = arith.constant 0 : i32
    %c0_i32_1 = arith.constant 0 : i32
    return %arg0, %c0_i32, %arg1, %c0_i32_0 : i32, i32, i32, i32
  }
  func.func @transform_1(%arg0: i32, %arg1: i32) -> (i32, i32, i32, i32) {
    %c0_i32 = arith.constant 0 : i32
    %c0_i32_0 = arith.constant 0 : i32
    %c0_i32_1 = arith.constant 0 : i32
    return %arg0, %c0_i32, %arg1, %c0_i32_0 : i32, i32, i32, i32
  }
}

</mosaic_0001>

<bundles_post_ra>
// kernel: dir2dir_sum.1
= control target key start
LH: loop header
LB: loop body
LE: loop exit
PB: predicated region body
PF: predicated region fallthrough
CT: control target
= control target key end

     0   :  { %s851_s6 = smov 0   ;;  %s853_s7 = smov 0   ;;  %s1067_s0 = inlined_call_operand.vmem [shape: f32[2,4,4,256], index: 0, kind: input, shape index: {}]   ;;  %s1068_s1 = inlined_call_operand.vmem [shape: f32[2,4,4,256], index: 1, kind: output, shape index: {}]  }
   0x1   :  { %s855_s8 = smov 0  }
   0x2 LB: > { %s23_s9 = sadd.s32 1, %s817_s7  ;;  %p745_p0 = scmp.ge.s32.totalorder %s821_s8, 1  ;;  %s821_s8 = sphi %s855_s8, %s11_s8   ;;  %s817_s7 = sphi %s853_s7, %s1070_s7   ;;  %s813_s6 = sphi %s851_s6, %s1069_s6  }
   0x3   : > { %p25_p1 = scmp.ge.s32.totalorder %s23_s9, 2  ;;  %p107_p2 = scmp.lt.s32.totalorder %s821_s8, 3 }
   0x5   : > { %s1072_s9 = smov (%p25_p1, %s23_s9), 0  ;;  %p108_p3 = pnand %p745_p0, %p107_p2 }
   0x6   : > { %p135_p4 = scmp.lt.s32.totalorder (!%p108_p3), %s813_s6, 1  ;;  %s824_s14 = smov (!%p108_p3), 96  }
   0x7   : > { %111 = sbr.rel (%p108_p3) target bundleno = 305 (0x131), region = 24  ;;  %s825_s15 = smov (!%p108_p3), 112  }
   0x8   : > { %s826_s16 = smov (!%p108_p3), 64   ;;  %s827_s17 = smov (!%p108_p3), 80  }
   0x9   : > { %s828_s18 = smov (!%p108_p3), 2   ;;  %s829_s19 = smov (!%p108_p3), 1  }
   0xa   : > { %s830_s20 = smov (!%p108_p3), 127   ;;  %s831_s21 = smov (!%p108_p3), 126  }
   0xb   : > { %s832_s22 = smov (!%p108_p3), 34   ;;  %s833_s23 = smov (!%p108_p3), 17  }
   0xc   : > { %v823_v0 = vmov 0.0   ;;  %s1074_s6 = smov (!%p135_p4, %s813_s6), 1  ;;  %s834_s24 = smov 111   ;;  %vm340_vm0 = vcmask 1043456   ;;  %vm358_vm1 = vcmask 916480   ;;  %vm369_vm2 = vcmask 785408  }
   0xd   : > { %153 = vst [vmem:[#allocation2] sm:$0xf] %v823_v0  ;;  %s755_s10 = sshll.u32 %s1074_s6, 5  ;;  %s835_s25 = smov 94   ;;  %vm382_vm3 = vcmask 654336   ;;  %vm394_vm4 = vcmask 523264  }
   0xe   : > { %154 = vst [vmem:[#allocation2 + $0x10] sm:$0xf] %v823_v0  ;;  %s143_s13 = scalar_lea.vmem %s1067_s0, %s755_s10  ;;  %s836_s26 = smov 30   ;;  %vm220_vm5 = vcmask 15360   ;;  %vm253_vm6 = vcmask 7168   ;;  %vm295_vm9 = vcmask 1039360  }
   0xf   : > { %155 = vst [vmem:[#allocation2 + $0x20] sm:$0xf] %v823_v0  ;;  %v162_v1 = vld [vmem:[%s143_s13 + $0x8] sm:$0xff]  ;;  %v877_v2 = vld [vmem:[%s143_s13 + $0x10] sm:$0xff]  ;;  %v879_v3 = vld [vmem:[%s143_s13 + $0x18] sm:$0xff]  ;;  %s837_s27 = smov 15   ;;  %s998_s4 = scalar_lea.vmem %s1068_s1, %s755_s10 }
  0x10   : > { %156 = vst [vmem:[#allocation2 + $0x30] sm:$0xf] %v823_v0  ;;  %v161_v4 = vld [vmem:[%s143_s13] sm:$0xff]  ;;  %366 = vrot.lane.b32.xlu2 %v162_v1, %s824_s14  ;;  %s838_s28 = smov 113   ;;  %s839_s29 = smov 98   ;;  %vm328_vm12 = vcmask 1031168  }
  0x11   : > { %157 = vst [vmem:[#allocation2 + $0xc] sm:$0xf] %v823_v0  ;;  %s840_s30 = smov 32  }
  0x12   : > { %159 = vst [vmem:[#allocation2 + $0x2c] sm:$0xf] %v823_v0 }
  0x13   : > { %166 = vst [vmem:[#allocation2 + $0x14] sm:$0xff] %v162_v1 }
  0x14   : > { %167 = vst [vmem:[#allocation2 + $0x24] sm:$0xff] %v877_v2 }
  0x15   : > { %168 = vst [vmem:[#allocation2 + $0x34] sm:$0xff] %v879_v3 }
  0x16   : > { %165 = vst [vmem:[#allocation2 + $0x4] sm:$0xff] %v161_v4 }
  0x17   : > { %160 = vst [vmem:[#allocation2 + $0x3c] sm:$0xf] %v823_v0 }
  0x18   : > { %158 = vst [vmem:[#allocation2 + $0x1c] sm:$0xf] %v823_v0  ;;  %389 = vrot.lane.b32.xlu2 %v162_v1, %s826_s16  ;;  %v272_v14 = vld [vmem:[#allocation2 + $0xc] sm:$0xf] }
  0x19   : > { %v305_v18 = vld [vmem:[#allocation2 + $0xc] sm:$0xf] }
  0x1a   : > { %v883_v5 = vld [vmem:[#allocation2 + $0x18] sm:$0xf]  ;;  %v885_v6 = vld [vmem:[#allocation2 + $0x10] sm:$0xff]  ;;  %v476_v31 = vld [vmem:[#allocation2 + $0x2c] sm:$0xf] }
  0x1b   : > { %353 = vrot.lane.b32.xlu1 %v883_v5, %s825_s15  ;;  %351 = vrot.lane.b32.xlu0 %v885_v6, %s825_s15  ;;  %v417_v22 = vld [vmem:[#allocation2 + $0x28] sm:$0xf]  ;;  %v441_v26 = vld [vmem:[#allocation2 + $0x20] sm:$0xff]  ;;  %v501_v35 = vld [vmem:[#allocation2 + $0x2c] sm:$0xf] }
  0x1c   : > { %v442_v27 = vld [vmem:[#allocation2 + $0x28] sm:$0xf]  ;;  %v534_v39 = vld [vmem:[#allocation2 + $0x38] sm:$0xf]  ;;  %v533_v47 = vld [vmem:[#allocation2 + $0x30] sm:$0xff] }
  0x1d   : > { %v196_v7 = vld [vmem:[#allocation2] sm:$0xff]  ;;  %v197_v8 = vld [vmem:[#allocation2 + $0x8] sm:$0xf]  ;;  %v559_v43 = vld [vmem:[#allocation2 + $0x38] sm:$0xf] }
  0x1e   : > { %208 = vst [vmem:[#allocation1] ss:$2 sm:$0xff] %v196_v7  ;;  %v230_v10 = vld [vmem:[#allocation2 + $0x8] sm:$0xf]  ;;  %v593_v48 = vld [vmem:[#allocation2 + $0x3c] sm:$0xf] }
  0x1f   : > { %210 = vst [vmem:[#allocation1 + $0x10] ss:$2 sm:$0xff] %v197_v8  ;;  %v375_v9 = vld [vmem:[#allocation2 + $0x1c] sm:$0xf] }
  0x20   : > { %v618_v52 = vld [vmem:[#allocation2 + $0x3c] sm:$0xf] }
  0x23   : > { %379 = vrot.lane.b32.xlu1 %v375_v9, %s827_s17 }
  0x25   : > { %v211_v11 = vld.sshfl [vmem:[#allocation1] sm:$0xff pattern:$0x75316420]  ;;  %v212_v12 = vld.sshfl [vmem:[#allocation1 + $0x8] sm:$0xff pattern:$0x75316420] }
  0x26   : > { %214 = vrot.lane.b32.xlu0 %v211_v11, %s828_s18  ;;  %v213_v13 = vld.sshfl [vmem:[#allocation1 + $0x10] sm:$0xff pattern:$0x75316420]  ;;  %241 = vst [vmem:[#allocation1] ss:$2 sm:$0xff] %v196_v7 }
  0x27   : > { %243 = vst [vmem:[#allocation1 + $0x10] ss:$2 sm:$0xff] %v230_v10 }
  0x2b   : > { %218 = vrot.lane.b32.xlu1 %v213_v13, %s828_s18 }
  0x2d   : > { %v244_v15 = vld.sshfl [vmem:[#allocation1] sm:$0xff pattern:$0x75316420]  ;;  %v245_v16 = vld.sshfl [vmem:[#allocation1 + $0x8] sm:$0xff pattern:$0x75316420] }
  0x2e   : > { %216 = vrot.lane.b32.xlu0 %v212_v12, %s828_s18  ;;  %249 = vrot.lane.b32.xlu2 %v245_v16, %s829_s19  ;;  %264 = vst [vmem:[#allocation1] ss:$2 sm:$0xff] %v161_v4  ;;  %v246_v17 = vld.sshfl [vmem:[#allocation1 + $0x10] sm:$0xff pattern:$0x75316420] }
  0x2f   : > { %285 = vst [vmem:[#allocation1 + $0x10] ss:$2 sm:$0xff] %v272_v14  ;;  %v169_v14 = vlaneseq }
  0x31   : > { %v170_v16 = vand.u32 127, %v169_v14 }
  0x33   : > { %247 = vrot.lane.b32.xlu1 %v244_v15, %s829_s19 }
  0x35   : > { %v890_v19 = vld.sshfl [vmem:[#allocation1] sm:$0xff pattern:$0x75316420]  ;;  %v892_v20 = vld.sshfl [vmem:[#allocation1 + $0x8] sm:$0xff pattern:$0x75316420] }
  0x36   : > { %377 = vrot.lane.b32.xlu0 %v162_v1, %s827_s17  ;;  %283 = vst [vmem:[#allocation1] ss:$2 sm:$0xff] %v161_v4  ;;  %251 = vrot.lane.b32.xlu2 %v246_v17, %s829_s19  ;;  %v288_v21 = vld.sshfl [vmem:[#allocation1 + $0x10] sm:$0xff pattern:$0x75316420] }
  0x37   : > { %318 = vst [vmem:[#allocation1 + $0x10] ss:$2 sm:$0xff] %v305_v18 }
  0x3d   : > { %v287_v23 = vld.sshfl [vmem:[#allocation1 + $0x8] sm:$0xff pattern:$0x75316420]  ;;  %v286_v24 = vld.sshfl [vmem:[#allocation1] sm:$0xff pattern:$0x75316420] }
  0x3e   : > { %391 = vrot.lane.b32.xlu0 %v375_v9, %s826_s16  ;;  %291 = vrot.lane.b32.xlu1 %v287_v23, %s830_s20  ;;  %316 = vst [vmem:[#allocation1] ss:$2 sm:$0xff] %v161_v4  ;;  %v321_v25 = vld.sshfl [vmem:[#allocation1 + $0x10] sm:$0xff pattern:$0x75316420] }
  0x3f   : > { %293 = vrot.lane.b32.xlu2 %v288_v21, %s830_s20  ;;  %422 = vst [vmem:[#allocation1 + $0x10] ss:$2 sm:$0xff] %v417_v22  ;;  %v171_v22 = vadd.s32 128, %v170_v16 }
  0x45   : > { %v320_v28 = vld.sshfl [vmem:[#allocation1 + $0x8] sm:$0xff pattern:$0x75316420]  ;;  %v319_v29 = vld.sshfl [vmem:[#allocation1] sm:$0xff pattern:$0x75316420] }
  0x46   : > { %289 = vrot.lane.b32.xlu0 %v286_v24, %s830_s20  ;;  %324 = vrot.lane.b32.xlu1 %v320_v28, %s831_s21  ;;  %v425_v30 = vld.sshfl [vmem:[#allocation1 + $0x10] sm:$0xff pattern:$0x75316420]  ;;  %420 = vst [vmem:[#allocation1] ss:$2 sm:$0xff] %v441_v26 }
  0x47   : > { %447 = vst [vmem:[#allocation1 + $0x10] ss:$2 sm:$0xff] %v442_v27  ;;  %326 = vrot.lane.b32.xlu2 %v321_v25, %s831_s21  ;;  %v183_v27 = vand.u32 15, %v171_v22 }
  0x4d   : > { %v423_v32 = vld.sshfl [vmem:[#allocation1] sm:$0xff pattern:$0x75316420]  ;;  %v424_v33 = vld.sshfl [vmem:[#allocation1 + $0x8] sm:$0xff pattern:$0x75316420] }
  0x4e   : > { %322 = vrot.lane.b32.xlu0 %v319_v29, %s831_s21  ;;  %v450_v34 = vld.sshfl [vmem:[#allocation1 + $0x10] sm:$0xff pattern:$0x75316420]  ;;  %445 = vst [vmem:[#allocation1] ss:$2 sm:$0xff] %v441_v26  ;;  %428 = vrot.lane.b32.xlu1 %v424_v33, %s832_s22 }
  0x4f   : > { %481 = vst [vmem:[#allocation1 + $0x10] ss:$2 sm:$0xff] %v476_v31  ;;  %430 = vrot.lane.b32.xlu2 %v425_v30, %s832_s22 }
  0x55   : > { %v448_v36 = vld.sshfl [vmem:[#allocation1] sm:$0xff pattern:$0x75316420]  ;;  %v449_v37 = vld.sshfl [vmem:[#allocation1 + $0x8] sm:$0xff pattern:$0x75316420] }
  0x56   : > { %426 = vrot.lane.b32.xlu0 %v423_v32, %s832_s22  ;;  %v484_v38 = vld.sshfl [vmem:[#allocation1 + $0x10] sm:$0xff pattern:$0x75316420]  ;;  %453 = vrot.lane.b32.xlu1 %v449_v37, %s833_s23  ;;  %468 = vst [vmem:[#allocation1] ss:$2 sm:$0xff] %v877_v2  ;;  %v176_v37 = vand.u32 15, %v170_v16 }
  0x57   : > { %506 = vst [vmem:[#allocation1 + $0x10] ss:$2 sm:$0xff] %v501_v35  ;;  %455 = vrot.lane.b32.xlu2 %v450_v34, %s833_s23  ;;  %v931_v34 = vadd.s32 4294967294, %v183_v27  ;;  %v933_v35 = vadd.s32 4294967295, %v183_v27 }
  0x58   : > { %v981_v14 = vadd.s32 2, %v176_v37 }
  0x59   : > { %vm201_vm7 = vcmp.ge.s32.totalorder %v931_v34, 0  ;;  %vm234_vm8 = vcmp.ge.s32.totalorder %v933_v35, 0 }
  0x5d   : > { %v896_v40 = vld.sshfl [vmem:[#allocation1] sm:$0xff pattern:$0x75316420]  ;;  %v898_v41 = vld.sshfl [vmem:[#allocation1 + $0x8] sm:$0xff pattern:$0x75316420] }
  0x5e   : > { %451 = vrot.lane.b32.xlu0 %v448_v36, %s833_s23  ;;  %v509_v42 = vld.sshfl [vmem:[#allocation1 + $0x10] sm:$0xff pattern:$0x75316420]  ;;  %479 = vst [vmem:[#allocation1] ss:$2 sm:$0xff] %v877_v2 }
  0x5f   : > { %539 = vst [vmem:[#allocation1 + $0x10] ss:$2 sm:$0xff] %v534_v39  ;;  %489 = vrot.lane.b32.xlu2 %v484_v38, %s834_s24 }
  0x65   : > { %v482_v44 = vld.sshfl [vmem:[#allocation1] sm:$0xff pattern:$0x75316420]  ;;  %v483_v45 = vld.sshfl [vmem:[#allocation1 + $0x8] sm:$0xff pattern:$0x75316420] }
  0x66   : > { %v542_v46 = vld.sshfl [vmem:[#allocation1 + $0x10] sm:$0xff pattern:$0x75316420]  ;;  %514 = vrot.lane.b32.xlu0 %v509_v42, %s835_s25  ;;  %487 = vrot.lane.b32.xlu1 %v483_v45, %s834_s24  ;;  %504 = vst [vmem:[#allocation1] ss:$2 sm:$0xff] %v877_v2 }
  0x67   : > { %564 = vst [vmem:[#allocation1 + $0x10] ss:$2 sm:$0xff] %v559_v43  ;;  %547 = vrot.lane.b32.xlu2 %v542_v46, %s836_s26 }
  0x6a   : > { %v906_v55 = vpop.permute.xlu2 %366 }
  0x6b   : > { %v368_v18 = vrot.slane %v906_v55, 4 }
  0x6d   : > { %v903_v49 = vld.sshfl [vmem:[#allocation1] sm:$0xff pattern:$0x75316420]  ;;  %v508_v50 = vld.sshfl [vmem:[#allocation1 + $0x8] sm:$0xff pattern:$0x75316420]  ;;  %v370_v26 = vsel %vm369_vm2, %v368_v18, %v906_v55 }
  0x6e   : > { %485 = vrot.lane.b32.xlu0 %v482_v44, %s834_s24  ;;  %537 = vst [vmem:[#allocation1] ss:$2 sm:$0xff] %v533_v47  ;;  %v567_v51 = vld.sshfl [vmem:[#allocation1 + $0x10] sm:$0xff pattern:$0x75316420]  ;;  %vm432_vm2 = vcmask 277504  }
  0x6f   : > { %572 = vrot.lane.b32.xlu1 %v567_v51, %s837_s27  ;;  %598 = vst [vmem:[#allocation1 + $0x10] ss:$2 sm:$0xff] %v593_v48  ;;  %512 = vrot.lane.b32.xlu2 %v508_v50, %s835_s25  ;;  %v944_v48 = vadd.s32 4294967295, %v176_v37  ;;  %v947_v51 = vadd.s32 4294967294, %v176_v37 }
  0x71   : > { %vm233_vm10 = vcmp.ge.s32.totalorder %v944_v48, 0  ;;  %vm200_vm11 = vcmp.ge.s32.totalorder %v947_v51, 0 }
  0x72   : > { %v909_v59 = vpop.permute.xlu2 %389 }
  0x73   : > { %v393_v29 = vrot.slane %v909_v59, 4 }
  0x75   : > { %v540_v53 = vld.sshfl [vmem:[#allocation1] sm:$0xff pattern:$0x75316420]  ;;  %v541_v54 = vld.sshfl [vmem:[#allocation1 + $0x8] sm:$0xff pattern:$0x75316420] }
  0x76   : > { %562 = vst [vmem:[#allocation1] ss:$2 sm:$0xff] %v533_v47  ;;  %v601_v56 = vld.sshfl [vmem:[#allocation1 + $0x10] sm:$0xff pattern:$0x75316420] }
  0x77   : > { %545 = vrot.lane.b32.xlu1 %v541_v54, %s836_s26  ;;  %623 = vst [vmem:[#allocation1 + $0x10] ss:$2 sm:$0xff] %v618_v52  ;;  %543 = vrot.lane.b32.xlu2 %v540_v53, %s836_s26  ;;  %v949_v53 = vadd.s32 1, %v183_v27 }
  0x79   : > { %vm278_vm13 = vcmp.lt.s32.totalorder %v949_v53, 16 }
  0x7d   : > { %v566_v57 = vld.sshfl [vmem:[#allocation1 + $0x8] sm:$0xff pattern:$0x75316420]  ;;  %v565_v58 = vld.sshfl [vmem:[#allocation1] sm:$0xff pattern:$0x75316420] }
  0x7e   : > { %570 = vrot.lane.b32.xlu0 %v566_v57, %s837_s27  ;;  %585 = vst [vmem:[#allocation1] ss:$2 sm:$0xff] %v879_v3  ;;  %v626_v4 = vld.sshfl [vmem:[#allocation1 + $0x10] sm:$0xff pattern:$0x75316420]  ;;  %v958_v57 = vadd.s32 2, %v183_v27 }
  0x7f   : > { %606 = vrot.lane.b32.xlu1 %v601_v56, %s838_s28 }
  0x80   : > { %vm311_vm14 = vcmp.lt.s32.totalorder %v958_v57, 16 }
  0x85   : > { %v911_v60 = vld.sshfl [vmem:[#allocation1] sm:$0xff pattern:$0x75316420]  ;;  %v913_v61 = vld.sshfl [vmem:[#allocation1 + $0x8] sm:$0xff pattern:$0x75316420] }
  0x86   : > { %568 = vrot.lane.b32.xlu0 %v565_v58, %s837_s27  ;;  %596 = vst [vmem:[#allocation1] ss:$2 sm:$0xff] %v879_v3  ;;  %v961_v58 = vadd.s32 1, %v176_v37 }
  0x88   : > { %v916_v62 = vpop.permute.xlu2 %249  ;;  %vm277_vm15 = vcmp.lt.s32.totalorder %v961_v58, 16 }
  0x8d   : > { %v600_v63 = vld.sshfl [vmem:[#allocation1 + $0x8] sm:$0xff pattern:$0x75316420]  ;;  %v354_v0 = vpop.permute.xlu1 %353  ;;  %v599_v1 = vld.sshfl [vmem:[#allocation1] sm:$0xff pattern:$0x75316420]  ;;  %v352_v2 = vpop.permute.xlu0 %351 }
  0x8e   : > { %604 = vrot.lane.b32.xlu0 %v600_v63, %s838_s28  ;;  %602 = vrot.lane.b32.xlu1 %v599_v1, %s838_s28  ;;  %621 = vst [vmem:[#allocation1] ss:$2 sm:$0xff] %v879_v3  ;;  %v356_v12 = vrot.slane %v354_v0, 4  ;;  %v355_v13 = vrot.slane %v352_v2, 4  ;;  %v363_v31 = vadd.f32 %v354_v0, %v883_v5 }
  0x90   : > { %v252_v7 = vpop.permute.xlu2 %251  ;;  %v357_v3 = vsel %vm340_vm0, %v355_v13, %v356_v12  ;;  %v374_v42 = vadd.f32 %v368_v18, %v363_v31 }
  0x91   : > { %v359_v21 = vsel %vm358_vm1, %v352_v2, %v357_v3  ;;  %v255_v47 = vsel %vm253_vm6, %v916_v62, %v252_v7  ;;  %vm310_vm1 = vcmp.lt.s32.totalorder %v981_v14, 16 }
  0x92   : > { %v362_v24 = vadd.f32 %v359_v21, %v885_v6  ;;  %v395_v6 = vsel %vm394_vm4, %v393_v29, %v909_v59  ;;  %v259_v55 = vsel %vm234_vm8, %v255_v47, 0.0 }
  0x94   : > { %v373_v32 = vadd.f32 %v370_v26, %v362_v24 }
  0x95   : > { %v380_v8 = vpop.permute.xlu1 %379  ;;  %v625_v9 = vld.sshfl [vmem:[#allocation1 + $0x8] sm:$0xff pattern:$0x75316420] }
  0x96   : > { %631 = vrot.lane.b32.xlu0 %v626_v4, %s839_s29  ;;  %629 = vrot.lane.b32.xlu2 %v625_v9, %s839_s29 }
  0x98   : > { %v921_v10 = vpop.permute.xlu0 %214 }
  0x99   : > { %v923_v11 = vpop.permute.xlu2 %293 }
  0x9d   : > { %v219_v15 = vpop.permute.xlu1 %218 }
  0xa0   : > { %v217_v17 = vpop.permute.xlu0 %216 }
  0xa1   : > { %v327_v23 = vpop.permute.xlu2 %326  ;;  %v222_v46 = vsel %vm220_vm5, %v217_v17, %v219_v15  ;;  %v221_v59 = vsel %vm220_vm5, %v921_v10, %v217_v17  ;;  %vm516_vm5 = vcmask 769024  }
  0xa2   : > { %v226_v54 = vsel %vm201_vm7, %v222_v46, 0.0  ;;  %v225_v9 = vsel %vm200_vm11, %v221_v59, 0.0 }
  0xa3   : > { %v261_v63 = vadd.f32 %v259_v55, %v226_v54 }
  0xa5   : > { %v248_v25 = vpop.permute.xlu1 %247  ;;  %v270_v12 = vadd.f32 %v892_v20, %v261_v63 }
  0xa6   : > { %v254_v56 = vsel %vm253_vm6, %v248_v25, %v916_v62  ;;  %vm549_vm6 = vcmask 244736  }
  0xa7   : > { %v258_v62 = vsel %vm233_vm10, %v254_v56, 0.0 }
  0xa8   : > { %v378_v28 = vpop.permute.xlu0 %377 }
  0xa9   : > { %v381_v30 = vrot.slane %v378_v28, 4  ;;  %v937_v39 = vpop.permute.xlu2 %430 }
  0xab   : > { %v383_v33 = vsel %vm382_vm3, %v381_v30, %v378_v28  ;;  %v384_v38 = vsel %vm382_vm3, %v381_v30, %v380_v8  ;;  %v624_v8 = vld.sshfl [vmem:[#allocation1] sm:$0xff pattern:$0x75316420]  ;;  %vm457_vm3 = vcmask 138240  }
  0xac   : > { %v387_v36 = vadd.f32 %v383_v33, %v373_v32  ;;  %v388_v5 = vadd.f32 %v384_v38, %v374_v42 }
  0xae   : > { %v399_v43 = vadd.f32 %v395_v6, %v387_v36 }
  0xb0   : > { %v392_v44 = vpop.permute.xlu0 %391  ;;  %v292_v45 = vpop.permute.xlu1 %291  ;;  %403 = vrot.lane.b32.xlu1 %v399_v43, %s840_s30 }
  0xb1   : > { %v396_v50 = vsel %vm394_vm4, %v393_v29, %v392_v44  ;;  %v297_v0 = vsel %vm295_vm9, %v292_v45, %v923_v11  ;;  %v456_v1 = vpop.permute.xlu2 %455  ;;  %v260_v11 = vadd.f32 %v258_v62, %v225_v9  ;;  %vm491_vm4 = vcmask 908288  }
  0xb2   : > { %v400_v52 = vadd.f32 %v396_v50, %v388_v5  ;;  %v301_v10 = vsel %vm278_vm13, %v297_v0, 0.0 }
  0xb3   : > { %v303_v15 = vadd.f32 %v301_v10, %v270_v12  ;;  %v269_v16 = vadd.f32 %v890_v19, %v260_v11 }
  0xb4   : > { %405 = vrot.lane.b32.xlu2 %v400_v52, %s840_s30 }
  0xb8   : > { %v290_v2 = vpop.permute.xlu0 %289  ;;  %v325_v4 = vpop.permute.xlu1 %324  ;;  %510 = vrot.lane.b32.xlu1 %v903_v49, %s835_s25 }
  0xb9   : > { %v330_v7 = vsel %vm328_vm12, %v325_v4, %v327_v23  ;;  %v296_v13 = vsel %vm295_vm9, %v290_v2, %v292_v45  ;;  %v490_v24 = vpop.permute.xlu2 %489  ;;  %vm574_vm9 = vcmask 121856  }
  0xba   : > { %v334_v49 = vsel %vm311_vm14, %v330_v7, 0.0  ;;  %v300_v3 = vsel %vm277_vm15, %v296_v13, 0.0 }
  0xbb   : > { %v336_v17 = vadd.f32 %v334_v49, %v303_v15  ;;  %v302_v21 = vadd.f32 %v300_v3, %v269_v16 }
  0xbc   : > { %627 = vrot.lane.b32.xlu2 %v624_v8, %s839_s29 }
  0xbd   : > { %v339_v25 = vrot.slane %v336_v17, 4 }
  0xc0   : > { %v323_v20 = vpop.permute.xlu0 %322  ;;  %v429_v18 = vpop.permute.xlu1 %428 }
  0xc1   : > { %v329_v22 = vsel %vm328_vm12, %v323_v20, %v325_v4  ;;  %v434_v27 = vsel %vm432_vm2, %v429_v18, %v937_v39  ;;  %v548_v6 = vpop.permute.xlu2 %547  ;;  %vm608_vm12 = vcmask 924672  }
  0xc2   : > { %v333_v23 = vsel %vm310_vm1, %v329_v22, 0.0  ;;  %v438_v29 = vsel %vm201_vm7, %v434_v27, 0.0 }
  0xc3   : > { %v335_v26 = vadd.f32 %v333_v23, %v302_v21 }
  0xc5   : > { %v341_v19 = vsel %vm340_vm0, %v335_v26, %v339_v25 }
  0xc6   : > { %343 = vst [vmem:[%s998_s4] sm:$0xff] %v341_v19 }
  0xc8   : > { %v427_v28 = vpop.permute.xlu0 %426  ;;  %v454_v30 = vpop.permute.xlu1 %453 }
  0xc9   : > { %v433_v31 = vsel %vm432_vm2, %v427_v28, %v429_v18  ;;  %v459_v32 = vsel %vm457_vm3, %v454_v30, %v456_v1  ;;  %v1011_v5 = vpop.permute.xlu2 %512 }
  0xca   : > { %v463_v33 = vsel %vm234_vm8, %v459_v32, 0.0  ;;  %v437_v38 = vsel %vm200_vm11, %v433_v31, 0.0 }
  0xcb   : > { %v465_v36 = vadd.f32 %v463_v33, %v438_v29 }
  0xcd   : > { %v474_v44 = vadd.f32 %v898_v41, %v465_v36 }
  0xd0   : > { %v452_v37 = vpop.permute.xlu0 %451 }
  0xd1   : > { %v458_v42 = vsel %vm457_vm3, %v452_v37, %v454_v30  ;;  %v544_v12 = vpop.permute.xlu2 %543 }
  0xd2   : > { %v462_v39 = vsel %vm233_vm10, %v458_v42, 0.0 }
  0xd3   : > { %v464_v43 = vadd.f32 %v462_v39, %v437_v38 }
  0xd5   : > { %v473_v59 = vadd.f32 %v896_v40, %v464_v43 }
  0xd8   : > { %v515_v45 = vpop.permute.xlu0 %514  ;;  %v488_v46 = vpop.permute.xlu1 %487 }
  0xd9   : > { %v493_v47 = vsel %vm491_vm4, %v488_v46, %v490_v24  ;;  %v518_v50 = vsel %vm516_vm5, %v1011_v5, %v515_v45 }
  0xda   : > { %v497_v52 = vsel %vm278_vm13, %v493_v47, 0.0  ;;  %v522_v54 = vsel %vm311_vm14, %v518_v50, 0.0 }
  0xdb   : > { %v499_v55 = vadd.f32 %v497_v52, %v474_v44 }
  0xdd   : > { %v1020_v56 = vadd.f32 %v522_v54, %v499_v55 }
  0xdf   : > { %v527_v39 = vrot.slane %v1020_v56, 4 }
  0xe0   : > { %v486_v63 = vpop.permute.xlu0 %485 }
  0xe1   : > { %v492_v0 = vsel %vm491_vm4, %v486_v63, %v488_v46  ;;  %v573_v1 = vpop.permute.xlu1 %572 }
  0xe2   : > { %v496_v41 = vsel %vm277_vm15, %v492_v0, 0.0 }
  0xe3   : > { %v498_v62 = vadd.f32 %v496_v41, %v473_v59 }
  0xe9   : > { %v546_v2 = vpop.permute.xlu1 %545 }
  0xea   : > { %v551_v4 = vsel %vm549_vm6, %v546_v2, %v548_v6  ;;  %v550_v16 = vsel %vm549_vm6, %v544_v12, %v546_v2 }
  0xeb   : > { %v555_v8 = vsel %vm311_vm14, %v551_v4, 0.0  ;;  %v554_v57 = vsel %vm310_vm1, %v550_v16, 0.0  ;;  %vm633_vm14 = vcmask 801792  }
  0xf0   : > { %v571_v7 = vpop.permute.xlu0 %570  ;;  %v630_v15 = vpop.permute.xlu2 %629 }
  0xf1   : > { %v576_v9 = vsel %vm574_vm9, %v571_v7, %v573_v1  ;;  %v607_v49 = vpop.permute.xlu1 %606 }
  0xf2   : > { %v580_v40 = vsel %vm278_vm13, %v576_v9, 0.0 }
  0xf3   : > { %v582_v10 = vadd.f32 %v580_v40, %v555_v8 }
  0xf5   : > { %v591_v18 = vadd.f32 %v913_v61, %v582_v10 }
  0xf8   : > { %v569_v11 = vpop.permute.xlu0 %568 }
  0xf9   : > { %v575_v3 = vsel %vm574_vm9, %v569_v11, %v571_v7 }
  0xfa   : > { %v579_v20 = vsel %vm277_vm15, %v575_v3, 0.0 }
  0xfb   : > { %v581_v24 = vadd.f32 %v579_v20, %v554_v57 }
  0xfd   : > { %v590_v27 = vadd.f32 %v911_v60, %v581_v24 }
 0x100   : > { %v605_v13 = vpop.permute.xlu0 %604  ;;  %v603_v22 = vpop.permute.xlu1 %602 }
 0x101   : > { %v610_v17 = vsel %vm608_vm12, %v605_v13, %v607_v49  ;;  %v609_v19 = vsel %vm608_vm12, %v603_v22, %v605_v13 }
 0x102   : > { %v614_v21 = vsel %vm234_vm8, %v610_v17, 0.0  ;;  %v613_v28 = vsel %vm233_vm10, %v609_v19, 0.0 }
 0x103   : > { %v616_v26 = vadd.f32 %v614_v21, %v591_v18  ;;  %v615_v29 = vadd.f32 %v613_v28, %v590_v27 }
 0x108   : > { %v632_v53 = vpop.permute.xlu0 %631 }
 0x109   : > { %v635_v25 = vsel %vm633_vm14, %v630_v15, %v632_v53 }
 0x10a   : > { %v639_v58 = vsel %vm201_vm7, %v635_v25, 0.0  ;;  %vm410_vm7 = vcmask 261120  }
 0x10b   : > { %v641_v61 = vadd.f32 %v639_v58, %v616_v26 }
 0x10d   : > { %v644_v32 = vrot.slane %v641_v61, 4 }
 0x10e   : > { %v406_v23 = vpop.permute.xlu2 %405 }
 0x10f   : > { %v408_v60 = vrot.slane %v406_v23, 4 }
 0x116   : > { %v628_v35 = vpop.permute.xlu2 %627 }
 0x117   : > { %v634_v30 = vsel %vm633_vm14, %v628_v35, %v630_v15 }
 0x118   : > { %v638_v31 = vsel %vm200_vm11, %v634_v30, 0.0 }
 0x119   : > { %v640_v33 = vadd.f32 %v638_v31, %v615_v29 }
 0x11b   : > { %v645_v34 = vsel %vm340_vm0, %v640_v33, %v644_v32 }
 0x11c   : > { %752 = vst [vmem:[%s998_s4 + $0x18] sm:$0xff] %v645_v34 }
 0x122   : > { %v404_v36 = vpop.permute.xlu1 %403 }
 0x123   : > { %v407_v48 = vrot.slane %v404_v36, 4 }
 0x125   : > { %v409_v6 = vsel %vm340_vm0, %v407_v48, %v408_v60 }
 0x126   : > { %v411_v37 = vsel %vm410_vm7, %v404_v36, %v409_v6 }
 0x127   : > { %750 = vst [vmem:[%s998_s4 + $0x8] sm:$0xff] %v411_v37 }
 0x12a   : > { %v511_v38 = vpop.permute.xlu1 %510 }
 0x12b   : > { %v517_v42 = vsel %vm516_vm5, %v511_v38, %v1011_v5 }
 0x12c   : > { %v521_v51 = vsel %vm310_vm1, %v517_v42, 0.0 }
 0x12d   : > { %v523_v43 = vadd.f32 %v521_v51, %v498_v62 }
 0x12f   : > { %v528_v44 = vsel %vm340_vm0, %v523_v43, %v527_v39 }
 0x130   : > { %751 = vst [vmem:[%s998_s4 + $0x10] sm:$0xff] %v528_v44 }
 0x131 PF: > { %s11_s8 = sadd.s32 1, %s821_s8   ;;  %s1069_s6 = smov %s817_s7 }
 0x132   : > { %p8_p5 = scmp.ge.s32.totalorder %s11_s8, 4   ;;  %s1070_s7 = smov %s1072_s9 }
 0x134   :  { %10 = sbr.rel (!%p8_p5) target bundleno = 2 (0x2), region = 72 }

</bundles_post_ra>
